<compile_context>
chip_gen: v6e
topology: v6e:2x2x1
jax: 0.10.0
libtpu: 0.0.40
codegen_flags: <defaults>
</compile_context>

<pallas_src>
import functools
import math

import jax
import jax.numpy as jnp
from jax.experimental import pallas as pl
from jax.experimental.pallas import tpu as pltpu


def _attn_fusion_kernel(x_ref, o_ref, *, cav_num, inv_sqrt_dim):
    # x_ref: (cav_num, C, T)   o_ref: (C, T)   -- spatial axis T on lanes.
    q0 = x_ref[0].astype(jnp.float32)                            # (C, T)

    # scores[m] = <q0, x_m> over channels, per spatial position -> (1, T).
    # Unrolled over the small agent axis; channel reduce is sublane-only.
    scores = []
    for m in range(cav_num):
        xm = q0 if m == 0 else x_ref[m].astype(jnp.float32)      # (C, T)
        scores.append(jnp.sum(q0 * xm, axis=0, keepdims=True) * inv_sqrt_dim)

    # Numerically stable softmax over agents, fully per-lane (unrolled).
    mx = scores[0]
    for s in scores[1:]:
        mx = jnp.maximum(mx, s)

    denom = jnp.exp(scores[0] - mx)
    for s in scores[1:]:
        denom = denom + jnp.exp(s - mx)
    inv_d = 1.0 / denom                                          # exact, (1, T) only

    # context = sum_m softmax_m * x_m  -> (C, T).  exp is recomputed per agent
    # (EUP slot, cheap) to keep the (1, T) working set small; agent-0 reuses q0.
    ctx = (jnp.exp(scores[0] - mx) * inv_d) * q0
    for m in range(1, cav_num):
        w = jnp.exp(scores[m] - mx) * inv_d
        ctx = ctx + w * x_ref[m].astype(jnp.float32)

    o_ref[...] = ctx.astype(o_ref.dtype)


def attention_fusion(x, *, tile_n=2048):
    """x: (cav_num, C, H, W)  ->  (C, H, W), matching AttentionFusion.forward."""
    cav_num, C, H, W = x.shape
    N = H * W
    itemsize = jnp.dtype(x.dtype).itemsize

    # Free reshape: contiguous NCHW -> (cav_num, C, N).  No pad, no transpose.
    x_flat = x.reshape(cav_num, C, N)

    # ---- tile sizing ----------------------------------------------------
    # Keep double-buffered (input block + output block) within ~24 MiB so the
    # same tile fits v5e (raised scoped limit), v6e (32 MiB default) and v7x
    # (64 MiB physical) with headroom.  Tile floor 512 lanes for DMA efficiency.
    budget = 24 * 1024 * 1024
    per_pos_bytes = (cav_num + 1) * C * itemsize
    max_tile = max(512, (budget // (2 * per_pos_bytes)) // 128 * 128)

    if N < 1024 and N <= max_tile:
        # Single full-extent block (no 128-alignment requirement on a full dim).
        tile = N
    else:
        tile = max(512, (min(tile_n, max_tile) // 128) * 128)
        if N >= 1024:
            # Guarantee >= 2 grid blocks so v7x's two TensorCores both stream.
            two_block_tile = (((N + 1) // 2 + 127) // 128) * 128
            tile = max(512, min(tile, two_block_tile))
    grid = pl.cdiv(N, tile)   # partial last block: padded reads, masked store

    # ---- VMEM limit: actual need + margin, never the whole chip ----------
    in_block = cav_num * C * tile * itemsize
    out_block = C * tile * itemsize
    temp_f32 = 3 * C * tile * 4          # q0, ctx, one casted agent slab
    vmem_need = 2 * (in_block + out_block) + temp_f32
    vmem_limit = int(min(48 << 20, max(16 << 20, vmem_need + (4 << 20))))

    inv_sqrt_dim = 1.0 / math.sqrt(C)    # feature_dim == C in this module

    kernel = functools.partial(
        _attn_fusion_kernel, cav_num=cav_num, inv_sqrt_dim=inv_sqrt_dim)

    out_flat = pl.pallas_call(
        kernel,
        out_shape=jax.ShapeDtypeStruct((C, N), x.dtype),
        grid_spec=pltpu.PrefetchScalarGridSpec(
            num_scalar_prefetch=0,
            grid=(grid,),
            in_specs=[pl.BlockSpec((cav_num, C, tile), lambda i: (0, 0, i))],
            out_specs=pl.BlockSpec((C, tile), lambda i: (0, i)),
        ),
        compiler_params=pltpu.CompilerParams(
            dimension_semantics=("parallel",),   # shard spatial tiles on v7x's 2 TCs
            vmem_limit_bytes=vmem_limit,
        ),
    )(x_flat)

    # Free reshape: (C, N) -> (C, H, W).
    return out_flat.reshape(C, H, W)


def _reference(x):
    """Pure-JAX reference mirroring the PyTorch module."""
    cav_num, C, H, W = x.shape
    xf = jnp.transpose(x.reshape(cav_num, C, -1), (2, 0, 1)).astype(jnp.float32)
    score = jnp.einsum("nqc,nkc->nqk", xf, xf,
                       precision=jax.lax.Precision.HIGHEST) / math.sqrt(C)
    attn = jax.nn.softmax(score, axis=-1)
    ctx = jnp.einsum("nqk,nkc->nqc", attn, xf,
                     precision=jax.lax.Precision.HIGHEST)
    out = jnp.transpose(ctx, (1, 2, 0)).reshape(cav_num, C, H, W)[0]
    return out.astype(x.dtype)


if __name__ == "__main__":
    key = jax.random.PRNGKey(0)
    k1, k2 = jax.random.split(key)

    # 1) Small divisible case (single full-extent block).
    cav_num, C, H, W = 2, 4, 16, 16
    x1 = jax.random.normal(k1, (cav_num, C, H, W), dtype=jnp.float32)
    out1 = attention_fusion(x1)
    jax.block_until_ready(out1)
    ref1 = _reference(x1)
    assert out1.shape == (C, H, W)
    assert jnp.allclose(out1, ref1, atol=1e-4, rtol=1e-4)

    # 2) Non-divisible H*W (N = 1147): exercises the multi-block grid and the
    #    partial last block (no jnp.pad / output slice anywhere).
    x2 = jax.random.normal(k2, (3, 8, 37, 31), dtype=jnp.float32)
    out2 = attention_fusion(x2)
    jax.block_until_ready(out2)
    ref2 = _reference(x2)
    assert out2.shape == (8, 37, 31)
    assert jnp.allclose(out2, ref2, atol=1e-4, rtol=1e-4)

    print("KERNEL_OK")
</pallas_src>

<mosaic_0001>
module attributes {stable_mosaic.version = 11 : i64} {
  func.func @_attn_fusion_kernel(%arg0: i32, %arg1: memref<2x4x256xf32, #tpu.memory_space<vmem>>, %arg2: memref<4x256xf32, #tpu.memory_space<vmem>>) attributes {dimension_semantics = [#tpu.dimension_semantics<parallel>], iteration_bounds = array<i64: 1>, scalar_prefetch = 0 : i64, scratch_operands = 0 : i64, tpu.core_type = #tpu.core_type<tc>, window_params = [{transform_indices = @transform_0, window_bounds = array<i64: 2, 4, 256>}, {transform_indices = @transform_1, window_bounds = array<i64: 4, 256>}]} {
    %c0 = arith.constant 0 : index
    %c0_0 = arith.constant 0 : index
    %c0_1 = arith.constant 0 : index
    %0 = vector.load %arg1[%c0, %c0_0, %c0_1] : memref<2x4x256xf32, #tpu.memory_space<vmem>>, vector<1x4x256xf32>
    %1 = vector.shape_cast %0 : vector<1x4x256xf32> to vector<4x256xf32>
    %2 = arith.mulf %1, %1 : vector<4x256xf32>
    %cst = arith.constant dense<0.000000e+00> : vector<256xf32>
    %3 = vector.multi_reduction <add>, %2, %cst [0] : vector<4x256xf32> to vector<256xf32>
    %4 = vector.shape_cast %3 : vector<256xf32> to vector<1x256xf32>
    %cst_2 = arith.constant 5.000000e-01 : f32
    %5 = vector.broadcast %cst_2 : f32 to vector<1x256xf32>
    %6 = arith.mulf %4, %5 : vector<1x256xf32>
    %c1 = arith.constant 1 : index
    %c0_3 = arith.constant 0 : index
    %c0_4 = arith.constant 0 : index
    %7 = vector.load %arg1[%c1, %c0_3, %c0_4] : memref<2x4x256xf32, #tpu.memory_space<vmem>>, vector<1x4x256xf32>
    %8 = vector.shape_cast %7 : vector<1x4x256xf32> to vector<4x256xf32>
    %9 = arith.mulf %1, %8 : vector<4x256xf32>
    %cst_5 = arith.constant dense<0.000000e+00> : vector<256xf32>
    %10 = vector.multi_reduction <add>, %9, %cst_5 [0] : vector<4x256xf32> to vector<256xf32>
    %11 = vector.shape_cast %10 : vector<256xf32> to vector<1x256xf32>
    %cst_6 = arith.constant 5.000000e-01 : f32
    %12 = vector.broadcast %cst_6 : f32 to vector<1x256xf32>
    %13 = arith.mulf %11, %12 : vector<1x256xf32>
    %14 = arith.maximumf %6, %13 : vector<1x256xf32>
    %15 = arith.subf %6, %14 : vector<1x256xf32>
    %16 = math.exp %15 : vector<1x256xf32>
    %17 = arith.subf %13, %14 : vector<1x256xf32>
    %18 = math.exp %17 : vector<1x256xf32>
    %19 = arith.addf %16, %18 : vector<1x256xf32>
    %cst_7 = arith.constant 1.000000e+00 : f32
    %20 = vector.broadcast %cst_7 : f32 to vector<1x256xf32>
    %21 = arith.divf %20, %19 : vector<1x256xf32>
    %22 = arith.subf %6, %14 : vector<1x256xf32>
    %23 = math.exp %22 : vector<1x256xf32>
    %24 = arith.mulf %23, %21 : vector<1x256xf32>
    %25 = vector.broadcast %24 : vector<1x256xf32> to vector<4x256xf32>
    %26 = arith.mulf %25, %1 : vector<4x256xf32>
    %27 = arith.subf %13, %14 : vector<1x256xf32>
    %28 = math.exp %27 : vector<1x256xf32>
    %29 = arith.mulf %28, %21 : vector<1x256xf32>
    %c1_8 = arith.constant 1 : index
    %c0_9 = arith.constant 0 : index
    %c0_10 = arith.constant 0 : index
    %30 = vector.load %arg1[%c1_8, %c0_9, %c0_10] : memref<2x4x256xf32, #tpu.memory_space<vmem>>, vector<1x4x256xf32>
    %31 = vector.shape_cast %30 : vector<1x4x256xf32> to vector<4x256xf32>
    %32 = vector.broadcast %29 : vector<1x256xf32> to vector<4x256xf32>
    %33 = arith.mulf %32, %31 : vector<4x256xf32>
    %34 = arith.addf %26, %33 : vector<4x256xf32>
    %c0_11 = arith.constant 0 : index
    %c0_12 = arith.constant 0 : index
    %35 = vector.load %arg2[%c0_11, %c0_12] : memref<4x256xf32, #tpu.memory_space<vmem>>, vector<4x256xf32>
    tpu.vector_store %arg2[%c0_11, %c0_12], %34 {strides = array<i32>} : memref<4x256xf32, #tpu.memory_space<vmem>>, vector<4x256xf32>,
    return
  }
  func.func @transform_0(%arg0: i32) -> (i32, i32, i32) {
    %c0_i32 = arith.constant 0 : i32
    %c0_i32_0 = arith.constant 0 : i32
    %c0_i32_1 = arith.constant 0 : i32
    return %c0_i32, %c0_i32_0, %arg0 : i32, i32, i32
  }
  func.func @transform_1(%arg0: i32) -> (i32, i32) {
    %c0_i32 = arith.constant 0 : i32
    %c0_i32_0 = arith.constant 0 : i32
    return %c0_i32, %arg0 : i32, i32
  }
}

</mosaic_0001>

<bundles_post_ra>
// kernel: tpu_custom_call.1
= control target key start
LH: loop header
LB: loop body
LE: loop exit
PB: predicated region body
PF: predicated region fallthrough
CT: control target
= control target key end

     0   :  { %6 = vsyncpa [#allocation3], 0  ;;  %s219_s0 = inlined_call_operand.hbm [shape: f32[2,4,256], index: 0, kind: input, shape index: {}]   ;;  %s220_s1 = inlined_call_operand.hbm [shape: f32[4,256], index: 1, kind: output, shape index: {}]  }
   0x1   :  { %7 = vsyncpa [#allocation4], 0  ;;  %s185_s6 = smov [#allocation2]  }
   0x2   :  { %s13_s7 = sshll.u32 %s185_s6, 4  ;;  %s14_s7 = int_to_ptr.vmem [resolvable:$true] %s13_s7 }
   0x3   :  { %s149_s8 = scalar_lea.vmem %s14_s7, 256  ;;  %p154_p1 = scmp.lt.s32.totalorder %s14_s7, %s14_s7 }
   0x4   :  { %p150_p0 = scmp.ne.s32.totalorder %s14_s7, %s149_s8  ;;  %p155_p2 = scmp.lt.s32.totalorder %s149_s8, %s149_s8 }
   0x6   :  { %p156_p3 = por %p155_p2, %p154_p1 }
   0x8   :  { %p157_p4 = pnand %p156_p3, %p150_p0 }
   0xa   :  { %160 = shalt.err (!%p157_p4)
}
   0xb   :  { %s186_s9 = smov 128   ;;  %s187_s10 = smov 8  }
   0xc   :  { %19 = dma.hbm_to_vmem [thread:$0]  %s219_s0, 256, %s14_s7, [#allocation3], %s186_s9, %s186_s9, %s187_s10  }
   0xd   :  { %181 = dma.done.wait [#allocation3], 256  }
   0xe   :  { %182 = vsyncadd [#allocation3], 4294967040  ;;  %v202_v0 = vld [vmem:[#allocation2] sm:$0xff]  ;;  %vm28_vm0 = vcmask 1043456   ;;  %v204_v1 = vld [vmem:[#allocation2 + $0x8] sm:$0xff]  ;;  %s188_s0 = smov [#allocation5]  }
   0xf   :  { %v24_v2 = vmul.f32 %v202_v0, %v202_v0  ;;  %v47_v3 = vmul.f32 %v204_v1, %v202_v0  ;;  %v90_v56 = vcombine.high %v202_v0, %v202_v0  ;;  %v97_v58 = vcombine.high %v204_v1, %v204_v1  ;;  %s114_s13 = sshll.u32 %s188_s0, 4  ;;  %s115_s13 = int_to_ptr.vmem [resolvable:$true] %s114_s13 }
  0x10   :  { %s161_s14 = scalar_lea.vmem %s115_s13, 128  ;;  %p166_p6 = scmp.lt.s32.totalorder %s115_s13, %s115_s13 }
  0x11   :  { %v26_v4 = vcombine.high %v24_v2, %v24_v2  ;;  %v29_v5 = vsel %vm28_vm0, %v24_v2, 0.0  ;;  %v49_v6 = vcombine.high %v47_v3, %v47_v3  ;;  %v51_v7 = vsel %vm28_vm0, %v47_v3, 0.0  ;;  %p162_p5 = scmp.ne.s32.totalorder %s115_s13, %s161_s14  ;;  %p167_p7 = scmp.lt.s32.totalorder %s161_s14, %s161_s14 }
  0x12   :  { %v30_v8 = vrot.slane %v29_v5, 4  ;;  %v52_v9 = vrot.slane %v51_v7, 4 }
  0x13   :  { %v36_v10 = vsel %vm28_vm0, %v26_v4, 0.0  ;;  %v58_v11 = vsel %vm28_vm0, %v49_v6, 0.0  ;;  %p168_p8 = por %p167_p7, %p166_p6 }
  0x14   :  { %v31_v12 = vadd.f32 %v30_v8, %v29_v5  ;;  %v37_v13 = vrot.slane %v36_v10, 4  ;;  %v53_v14 = vadd.f32 %v52_v9, %v51_v7  ;;  %v59_v15 = vrot.slane %v58_v11, 4 }
  0x15   :  { %p169_p9 = pnand %p168_p8, %p162_p5 }
  0x16   :  { %v32_v16 = vrot.slane %v31_v12, 2  ;;  %v38_v17 = vadd.f32 %v37_v13, %v36_v10  ;;  %v54_v18 = vrot.slane %v53_v14, 2  ;;  %v60_v19 = vadd.f32 %v59_v15, %v58_v11 }
  0x18   :  { %v33_v20 = vadd.f32 %v32_v16, %v31_v12  ;;  %v39_v21 = vrot.slane %v38_v17, 2  ;;  %v55_v22 = vadd.f32 %v54_v18, %v53_v14  ;;  %v61_v23 = vrot.slane %v60_v19, 2 }
  0x1a   :  { %v34_v24 = vrot.slane %v33_v20, 1  ;;  %v40_v25 = vadd.f32 %v39_v21, %v38_v17  ;;  %v56_v26 = vrot.slane %v55_v22, 1  ;;  %v62_v27 = vadd.f32 %v61_v23, %v60_v19 }
  0x1c   :  { %v35_v28 = vadd.f32 %v34_v24, %v33_v20  ;;  %v41_v29 = vrot.slane %v40_v25, 1  ;;  %v57_v30 = vadd.f32 %v56_v26, %v55_v22  ;;  %v63_v31 = vrot.slane %v62_v27, 1 }
  0x1e   :  { %v42_v32 = vadd.f32 %v41_v29, %v40_v25  ;;  %v43_v33 = vmul.f32 0.5, %v35_v28  ;;  %v64_v34 = vadd.f32 %v63_v31, %v62_v27  ;;  %v65_v35 = vmul.f32 0.5, %v57_v30 }
  0x20   :  { %v44_v36 = vmul.f32 0.5, %v42_v32  ;;  %v66_v37 = vmul.f32 0.5, %v64_v34  ;;  %v67_v38 = vmax.f32 %v43_v33, %v65_v35 }
  0x22   :  { %v68_v39 = vmax.f32 %v44_v36, %v66_v37  ;;  %v69_v40 = vsub.f32 %v43_v33, %v67_v38  ;;  %v75_v41 = vsub.f32 %v65_v35, %v67_v38 }
  0x24   :  { %v70_v42 = vsub.f32 %v44_v36, %v68_v39  ;;  %v71_v43 = vmul.f32 1.442695, %v69_v40  ;;  %v76_v44 = vsub.f32 %v66_v37, %v68_v39  ;;  %v77_v45 = vmul.f32 1.442695, %v75_v41 }
  0x26   :  { %129 = vpow2.f32 %v71_v43  ;;  %v73_v46 = vmul.f32 1.442695, %v70_v42  ;;  %v79_v47 = vmul.f32 1.442695, %v76_v44 }
  0x27   :  { %131 = vpow2.f32 %v77_v45 }
  0x28   :  { %133 = vpow2.f32 %v73_v46 }
  0x29   :  { %135 = vpow2.f32 %v79_v47 }
  0x33   :  { %v130_v48 = vpop.eup %129 }
  0x34   :  { %v132_v49 = vpop.eup %131 }
  0x35   :  { %v134_v50 = vpop.eup %133  ;;  %v81_v51 = vadd.f32 %v132_v49, %v130_v48 }
  0x36   :  { %v136_v52 = vpop.eup %135 }
  0x37   :  { %v82_v53 = vadd.f32 %v136_v52, %v134_v50  ;;  %137 = vrcp.f32 %v81_v51 }
  0x39   :  { %139 = vrcp.f32 %v82_v53 }
  0x44   :  { %v138_v54 = vpop.eup %137 }
  0x45   :  { %v87_v55 = vmul.f32 %v138_v54, %v130_v48  ;;  %v94_v57 = vmul.f32 %v138_v54, %v132_v49 }
  0x46   :  { %v140_v59 = vpop.eup %139 }
  0x47   :  { %v88_v60 = vmul.f32 %v140_v59, %v134_v50  ;;  %v92_v61 = vmul.f32 %v87_v55, %v202_v0  ;;  %v95_v62 = vmul.f32 %v140_v59, %v136_v52  ;;  %v99_v63 = vmul.f32 %v94_v57, %v204_v1 }
  0x49   :  { %v93_v2 = vmul.f32 %v90_v56, %v88_v60  ;;  %v100_v3 = vmul.f32 %v97_v58, %v95_v62  ;;  %v101_v4 = vadd.f32 %v99_v63, %v92_v61 }
  0x4b   :  { %v102_v5 = vadd.f32 %v100_v3, %v93_v2 }
  0x4d   :  { %v105_v6 = vcombine.low %v101_v4, %v102_v5 }
  0x4f   :  { %107 = vst [vmem:[#allocation5] sm:$0xff] %v105_v6 }
  0x50   :  { %172 = shalt.err (!%p169_p9)
}
  0x51   :  { %117 = dma.vmem_to_hbm [thread:$0]  %s115_s13, 128, %s220_s1, [#allocation4]  }
  0x52   :  { %183 = dma.done.wait [#allocation4], 128  }
  0x53   :  { %184 = vsyncadd [#allocation4], 4294967168 }
  0x54   :  { %121 = vsyncpa [#allocation3], 1 }
  0x55   :  { %122 = vsyncpa [#allocation4], 1 }

</bundles_post_ra>
